<compile_context>
chip_gen: v5e
topology: v5e:2x2
jax: 0.10.0
libtpu: 0.0.40
codegen_flags: <defaults>
</compile_context>

<pallas_src>
import jax
import jax.numpy as jnp
from jax.experimental import pallas as pl
from jax.experimental.pallas import tpu as pltpu


# Set to jnp.bfloat16 to cut MXU push count ~3-8x on all generations
# (introduces ~1e-3 error; loosen the self-test tolerance if enabled).
_MATMUL_DTYPE = jnp.float32

_MAX_TILE = 32768     # upper bound on the batch (lane) tile for the gridded path
_SMALL_BATCH = 1024   # <= this: single fused no-grid invocation (launch-dominated)


def _cdiv(a, b):
    return (a + b - 1) // b


def _round_up(a, m):
    return _cdiv(a, m) * m


def mlp_kernel(x_ref,
               wa_ref, ba_ref,
               wb_ref, bb_ref,
               wc_ref, bc_ref,
               wd_ref, bd_ref,
               o_ref):
    """Fused forward pass on one batch tile.

    Layout: x_ref is (in_features=2, tile_batch) -- batch on the 128-wide lane
    axis; weights are torch-layout (out, in), pre-folded (see _fold_params);
    biases are (out, 1); output is (2, tile_batch).
    """
    x = x_ref[...]                                  # (2, tb)
    wa = wa_ref[...]                                # (20, 2) = 0.5*W_A

    # Layer A (K=2): two broadcast multiply-adds on the VPU -- cheaper than an
    # MXU round-trip for a 2-deep contraction.  Sigmoid affine already folded.
    t = jnp.tanh(wa[:, 0:1] * x[0:1, :] + wa[:, 1:2] * x[1:2, :] + ba_ref[...])

    def mm(w_ref, h):
        return jnp.dot(w_ref[...].astype(_MATMUL_DTYPE),
                       h.astype(_MATMUL_DTYPE),
                       preferred_element_type=jnp.float32)

    # Layers B, C: bare tanh (sigmoid scale/offset folded into next weights).
    t = jnp.tanh(mm(wb_ref, t) + bb_ref[...])       # (30, tb)
    t = jnp.tanh(mm(wc_ref, t) + bc_ref[...])       # (20, tb)

    # Layer D: final sigmoid epilogue, only on the tiny (2, tb) output.
    z = mm(wd_ref, t) + bd_ref[...]                 # (2, tb)
    o_ref[...] = (0.5 * jnp.tanh(z) + 0.5).astype(o_ref.dtype)


def _fold_params(params):
    """Fold sigmoid(z) = 0.5*tanh(0.5*z) + 0.5 into the weights (done once,
    outside the kernel). Returns torch-layout (out, in) weights and (out, 1)
    biases such that the kernel only needs bare tanh for layers A-C."""
    wa = 0.5 * params["wA"]
    ba = (0.5 * params["bA"])[:, None]

    def fold(w, b):
        # next-layer input is 0.5*t + 0.5, and tanh argument is 0.5*z
        return 0.25 * w, (0.25 * jnp.sum(w, axis=1) + 0.5 * b)[:, None]

    wb, bb = fold(params["wB"], params["bB"])
    wc, bc = fold(params["wC"], params["bC"])
    wd, bd = fold(params["wD"], params["bD"])
    return wa, ba, wb, bb, wc, bc, wd, bd


@jax.jit
def mlp_forward(x, params):
    """x: (batch, 2). params: torch nn.Linear convention -- weight (out, in),
    bias (out,). Returns (batch, 2)."""
    batch = x.shape[0]
    folded = _fold_params(params)
    out_feats = params["wD"].shape[0]

    # Lane-dense layout: batch on the last (lane) axis.
    xT = x.T                                        # (2, batch)

    if batch <= _SMALL_BATCH:
        # Everything fits trivially in VMEM: one fused invocation, no grid.
        vmem = pl.BlockSpec(memory_space=pltpu.MemorySpace.VMEM)
        outT = pl.pallas_call(
            mlp_kernel,
            out_shape=jax.ShapeDtypeStruct((out_feats, batch), x.dtype),
            in_specs=[vmem] * 9,
            out_specs=vmem,
        )(xT, *folded)
        return outT.T

    # Gridded path: 1-D parallel grid over large batch tiles.
    #  - tile as large as possible (amortizes ~0.35 us/step overhead),
    #  - but n_tiles >= 2 and even, so both v7x TensorCores get equal work.
    n_target = max(2, _cdiv(batch, _MAX_TILE))
    n_target += n_target % 2
    tile = _round_up(_cdiv(batch, n_target), 256)   # multiple of 128-lane vregs
    n_tiles = _cdiv(batch, tile)
    padded = n_tiles * tile
    if padded != batch:
        # Fuses with the transpose above into a single copy under jit.
        xT = jnp.pad(xT, ((0, 0), (0, padded - batch)))

    def const_spec(a):
        # Full-extent block, constant block index -> DMA'd once, VMEM-resident.
        return pl.BlockSpec(a.shape, lambda i: (0, 0))

    outT = pl.pallas_call(
        mlp_kernel,
        out_shape=jax.ShapeDtypeStruct((out_feats, padded), x.dtype),
        grid=(n_tiles,),
        in_specs=[pl.BlockSpec((xT.shape[0], tile), lambda i: (0, i))]
                 + [const_spec(a) for a in folded],
        out_specs=pl.BlockSpec((out_feats, tile), lambda i: (0, i)),
        compiler_params=pltpu.CompilerParams(
            dimension_semantics=("parallel",)),
    )(xT, *folded)
    return outT[:, :batch].T


def init_params(key):
    """Deterministic init mimicking torch.nn.Linear default U(-1/sqrt(in), 1/sqrt(in))."""
    sizes = [("A", 2, 20), ("B", 20, 30), ("C", 30, 20), ("D", 20, 2)]
    params = {}
    for name, fan_in, fan_out in sizes:
        key, kw, kb = jax.random.split(key, 3)
        bound = 1.0 / jnp.sqrt(jnp.float32(fan_in))
        params[f"w{name}"] = jax.random.uniform(
            kw, (fan_out, fan_in), jnp.float32, minval=-bound, maxval=bound)
        params[f"b{name}"] = jax.random.uniform(
            kb, (fan_out,), jnp.float32, minval=-bound, maxval=bound)
    return params


def reference_forward(x, params):
    """Plain-JAX reference matching the PyTorch forward exactly (unfolded params)."""
    h = jax.nn.sigmoid(x @ params["wA"].T + params["bA"])
    h = jax.nn.sigmoid(h @ params["wB"].T + params["bB"])
    h = jax.nn.sigmoid(h @ params["wC"].T + params["bC"])
    h = jax.nn.sigmoid(h @ params["wD"].T + params["bD"])
    return h


# TODO(synk): Model.loss (nn.MSELoss) is a training-only helper, not part of forward; not kernelized.


if __name__ == "__main__":
    key = jax.random.PRNGKey(0)
    key, kx = jax.random.split(key)
    params = init_params(key)

    # Small-batch path (single fused no-grid invocation).
    batch = 8
    x = jax.random.normal(kx, (batch, 2), jnp.float32)
    out = jax.block_until_ready(mlp_forward(x, params))
    ref = reference_forward(x, params)
    assert out.shape == (batch, 2), out.shape
    assert jnp.allclose(out, ref, atol=2e-5, rtol=2e-5), (
        f"small-batch max abs err = {jnp.max(jnp.abs(out - ref))}")

    # Gridded / pipelined path (2 parallel tiles, resident weights, padding).
    big = 4096 + 37   # deliberately not a multiple of the tile
    xb = jax.random.normal(jax.random.PRNGKey(1), (big, 2), jnp.float32)
    outb = jax.block_until_ready(mlp_forward(xb, params))
    refb = reference_forward(xb, params)
    assert outb.shape == (big, 2), outb.shape
    assert jnp.allclose(outb, refb, atol=2e-5, rtol=2e-5), (
        f"big-batch max abs err = {jnp.max(jnp.abs(outb - refb))}")

    print("KERNEL_OK")
</pallas_src>

<mosaic_0001>
module attributes {stable_mosaic.version = 11 : i64} {
  func.func @mlp_kernel(%arg0: memref<2x8xf32, #tpu.memory_space<vmem>>, %arg1: memref<20x2xf32, #tpu.memory_space<vmem>>, %arg2: memref<20x1xf32, #tpu.memory_space<vmem>>, %arg3: memref<30x20xf32, #tpu.memory_space<vmem>>, %arg4: memref<30x1xf32, #tpu.memory_space<vmem>>, %arg5: memref<20x30xf32, #tpu.memory_space<vmem>>, %arg6: memref<20x1xf32, #tpu.memory_space<vmem>>, %arg7: memref<2x20xf32, #tpu.memory_space<vmem>>, %arg8: memref<2x1xf32, #tpu.memory_space<vmem>>, %arg9: memref<2x8xf32, #tpu.memory_space<vmem>>) attributes {dimension_semantics = [], scalar_prefetch = 0 : i64, scratch_operands = 0 : i64, tpu.core_type = #tpu.core_type<tc>} {
    %c0 = arith.constant 0 : index
    %c0_0 = arith.constant 0 : index
    %0 = vector.load %arg0[%c0, %c0_0] : memref<2x8xf32, #tpu.memory_space<vmem>>, vector<2x8xf32>
    %c0_1 = arith.constant 0 : index
    %c0_2 = arith.constant 0 : index
    %1 = vector.load %arg1[%c0_1, %c0_2] : memref<20x2xf32, #tpu.memory_space<vmem>>, vector<20x2xf32>
    %2 = vector.extract_strided_slice %1 {offsets = [0, 0], sizes = [20, 1], strides = [1, 1]} : vector<20x2xf32> to vector<20x1xf32>
    %3 = vector.extract_strided_slice %0 {offsets = [0, 0], sizes = [1, 8], strides = [1, 1]} : vector<2x8xf32> to vector<1x8xf32>
    %4 = vector.broadcast %2 : vector<20x1xf32> to vector<20x8xf32>
    %5 = vector.broadcast %3 : vector<1x8xf32> to vector<20x8xf32>
    %6 = arith.mulf %4, %5 : vector<20x8xf32>
    %7 = vector.extract_strided_slice %1 {offsets = [0, 1], sizes = [20, 1], strides = [1, 1]} : vector<20x2xf32> to vector<20x1xf32>
    %8 = vector.extract_strided_slice %0 {offsets = [1, 0], sizes = [1, 8], strides = [1, 1]} : vector<2x8xf32> to vector<1x8xf32>
    %9 = vector.broadcast %7 : vector<20x1xf32> to vector<20x8xf32>
    %10 = vector.broadcast %8 : vector<1x8xf32> to vector<20x8xf32>
    %11 = arith.mulf %9, %10 : vector<20x8xf32>
    %12 = arith.addf %6, %11 : vector<20x8xf32>
    %c0_3 = arith.constant 0 : index
    %c0_4 = arith.constant 0 : index
    %13 = vector.load %arg2[%c0_3, %c0_4] : memref<20x1xf32, #tpu.memory_space<vmem>>, vector<20x1xf32>
    %14 = vector.broadcast %13 : vector<20x1xf32> to vector<20x8xf32>
    %15 = arith.addf %12, %14 : vector<20x8xf32>
    %16 = math.tanh %15 : vector<20x8xf32>
    %c0_5 = arith.constant 0 : index
    %c0_6 = arith.constant 0 : index
    %17 = vector.load %arg3[%c0_5, %c0_6] : memref<30x20xf32, #tpu.memory_space<vmem>>, vector<30x20xf32>
    %cst = arith.constant dense<0.000000e+00> : vector<30x8xf32>
    %18 = tpu.matmul %17, %16, %cst {dimension_numbers = #tpu.dot_dimension_numbers<[1], [0], [0], [1], [0, 0, 1, 1], [], []>} : vector<30x20xf32>, vector<20x8xf32>, vector<30x8xf32> -> vector<30x8xf32>
    %c0_7 = arith.constant 0 : index
    %c0_8 = arith.constant 0 : index
    %19 = vector.load %arg4[%c0_7, %c0_8] : memref<30x1xf32, #tpu.memory_space<vmem>>, vector<30x1xf32>
    %20 = vector.broadcast %19 : vector<30x1xf32> to vector<30x8xf32>
    %21 = arith.addf %18, %20 : vector<30x8xf32>
    %22 = math.tanh %21 : vector<30x8xf32>
    %c0_9 = arith.constant 0 : index
    %c0_10 = arith.constant 0 : index
    %23 = vector.load %arg5[%c0_9, %c0_10] : memref<20x30xf32, #tpu.memory_space<vmem>>, vector<20x30xf32>
    %cst_11 = arith.constant dense<0.000000e+00> : vector<20x8xf32>
    %24 = tpu.matmul %23, %22, %cst_11 {dimension_numbers = #tpu.dot_dimension_numbers<[1], [0], [0], [1], [0, 0, 1, 1], [], []>} : vector<20x30xf32>, vector<30x8xf32>, vector<20x8xf32> -> vector<20x8xf32>
    %c0_12 = arith.constant 0 : index
    %c0_13 = arith.constant 0 : index
    %25 = vector.load %arg6[%c0_12, %c0_13] : memref<20x1xf32, #tpu.memory_space<vmem>>, vector<20x1xf32>
    %26 = vector.broadcast %25 : vector<20x1xf32> to vector<20x8xf32>
    %27 = arith.addf %24, %26 : vector<20x8xf32>
    %28 = math.tanh %27 : vector<20x8xf32>
    %c0_14 = arith.constant 0 : index
    %c0_15 = arith.constant 0 : index
    %29 = vector.load %arg7[%c0_14, %c0_15] : memref<2x20xf32, #tpu.memory_space<vmem>>, vector<2x20xf32>
    %cst_16 = arith.constant dense<0.000000e+00> : vector<2x8xf32>
    %30 = tpu.matmul %29, %28, %cst_16 {dimension_numbers = #tpu.dot_dimension_numbers<[1], [0], [0], [1], [0, 0, 1, 1], [], []>} : vector<2x20xf32>, vector<20x8xf32>, vector<2x8xf32> -> vector<2x8xf32>
    %c0_17 = arith.constant 0 : index
    %c0_18 = arith.constant 0 : index
    %31 = vector.load %arg8[%c0_17, %c0_18] : memref<2x1xf32, #tpu.memory_space<vmem>>, vector<2x1xf32>
    %32 = vector.broadcast %31 : vector<2x1xf32> to vector<2x8xf32>
    %33 = arith.addf %30, %32 : vector<2x8xf32>
    %34 = math.tanh %33 : vector<2x8xf32>
    %cst_19 = arith.constant 5.000000e-01 : f32
    %35 = vector.broadcast %cst_19 : f32 to vector<2x8xf32>
    %36 = arith.mulf %35, %34 : vector<2x8xf32>
    %cst_20 = arith.constant 5.000000e-01 : f32
    %37 = vector.broadcast %cst_20 : f32 to vector<2x8xf32>
    %38 = arith.addf %36, %37 : vector<2x8xf32>
    %c0_21 = arith.constant 0 : index
    %c0_22 = arith.constant 0 : index
    %39 = vector.load %arg9[%c0_21, %c0_22] : memref<2x8xf32, #tpu.memory_space<vmem>>, vector<2x8xf32>
    tpu.vector_store %arg9[%c0_21, %c0_22], %38 {strides = array<i32>} : memref<2x8xf32, #tpu.memory_space<vmem>>, vector<2x8xf32>,
    return
  }
}

</mosaic_0001>

<bundles_post_ra>
// kernel: mlp_forward.1
= control target key start
LH: loop header
LB: loop body
LE: loop exit
PB: predicated region body
PF: predicated region fallthrough
CT: control target
= control target key end

     0   :  { %v372_v2 = vmov 1   ;;  %v373_v3 = vmov 0   ;;  %s505_s0 = inlined_call_operand.vmem [shape: f32[2,8], index: 0, kind: input, shape index: {}]   ;;  %s506_s1 = inlined_call_operand.vmem [shape: f32[20,2], index: 1, kind: input, shape index: {}]   ;;  %s507_s2 = inlined_call_operand.vmem [shape: f32[20,1], index: 2, kind: input, shape index: {}]   ;;  %s508_s3 = inlined_call_operand.vmem [shape: f32[30,20], index: 3, kind: input, shape index: {}]   ;;  %s509_s4 = inlined_call_operand.vmem [shape: f32[30,1], index: 4, kind: input, shape index: {}]   ;;  %s510_s5 = inlined_call_operand.vmem [shape: f32[20,30], index: 5, kind: input, shape index: {}]   ;;  %s511_s6 = inlined_call_operand.vmem [shape: f32[20,1], index: 6, kind: input, shape index: {}]   ;;  %s512_s7 = inlined_call_operand.vmem [shape: f32[2,20], index: 7, kind: input, shape index: {}]   ;;  %s513_s8 = inlined_call_operand.vmem [shape: f32[2,1], index: 8, kind: input, shape index: {}]   ;;  %s514_s9 = inlined_call_operand.hbm [shape: f32[2,8], index: 9, kind: output, shape index: {}]  }
   0x1   :  { %v36_v0 = vld [vmem:[%s506_s1 + $0x10] sm:$0xf]  ;;  %v35_v1 = vld [vmem:[%s506_s1 + $0x8] sm:$0xff]  ;;  %316 = vset.pattern.permute.xlu0 %v372_v2  ;;  %318 = vset.pattern.permute.xlu1 %v373_v3  ;;  %v34_v4 = vld [vmem:[%s506_s1] sm:$0xff] }
   0x2   :  { %65 = vperm.xlu0 %316, %v36_v0   ;;  %44 = vperm.xlu1 %318, %v35_v1  }
   0x3   :  { %320 = vset.pattern.permute.xlu2 %v373_v3 }
   0x4   :  { %14 = vsyncpa [#allocation3], 0  ;;  %39 = vperm.xlu2 %320, %v34_v4   ;;  %v75_v5 = vld [vmem:[%s507_s2] sm:$0xff]  ;;  %v77_v6 = vld [vmem:[%s507_s2 + $0x10] sm:$0xf]  ;;  %vm140_vm0 = vcmask 1043456  }
   0x5   :  { %v76_v7 = vld [vmem:[%s507_s2 + $0x8] sm:$0xff]  ;;  %v182_v8 = vld [vmem:[%s511_s6 + $0x10] sm:$0xf]  ;;  %v106_v9 = vld [vmem:[%s509_s4 + $0x18] sm:$0x3f]  ;;  %vm127_vm1 = vcmask 162816  }
   0x6   :  { %v105_v10 = vld [vmem:[%s509_s4 + $0x10] sm:$0xff]  ;;  %v242_v11 = vld [vmem:[%s513_s8] sm:$0x3]  ;;  %v104_v12 = vld [vmem:[%s509_s4 + $0x8] sm:$0xff]  ;;  %vm208_vm2 = vcmask 1045504   ;;  %vm198_vm3 = vcmask 244736  }
   0x7   :  { %v103_v13 = vld [vmem:[%s509_s4] sm:$0xff]  ;;  %v181_v14 = vld [vmem:[%s511_s6 + $0x8] sm:$0xff]  ;;  %v101_v43 = vld [vmem:[%s508_s3 + $0x10] sm:$0xff]  ;;  %s374_s25 = smov [#allocation2]   ;;  %s286_s28 = sshll.u32 %s514_s9, 4  ;;  %vm277_vm4 = vcmask 58368   ;;  %s287_s28 = int_to_ptr.hbm [resolvable:$true] %s286_s28 }
   0x8   :  { %v180_v15 = vld [vmem:[%s511_s6] sm:$0xff]  ;;  %v100_v45 = vld [vmem:[%s508_s3 + $0x8] sm:$0xff]  ;;  %v102_v46 = vld [vmem:[%s508_s3 + $0x18] sm:$0x3f]  ;;  %s284_s26 = sshll.u32 %s374_s25, 4  ;;  %s285_s26 = int_to_ptr.vmem [resolvable:$true] %s284_s26 }
   0x9   :  { %v33_v19 = vld [vmem:[%s505_s0] sm:$0x3]  ;;  %v179_v63 = vld [vmem:[%s510_s5 + $0x10] sm:$0xf] }
   0xa   :  { %317 = vset.pattern.permute.xlu0 %v373_v3  ;;  %319 = vset.pattern.permute.xlu1 %v372_v2  ;;  %v52_v21 = vperm.slane %v33_v19, 0  ;;  %v68_v22 = vperm.slane %v33_v19, 1  ;;  %v99_v42 = vld [vmem:[%s508_s3] sm:$0xff] }
   0xb   :  { %49 = vperm.xlu0 %317, %v36_v0   ;;  %61 = vperm.xlu1 %319, %v35_v1   ;;  %v177_v62 = vld [vmem:[%s510_s5] sm:$0xff]  ;;  %v178_v1 = vld [vmem:[%s510_s5 + $0x8] sm:$0xff] }
   0xc   :  { %321 = vset.pattern.permute.xlu2 %v372_v2 }
   0xd   :  { %57 = vperm.xlu2 %321, %v34_v4  }
  0x13   :  { %80 = vperm.xlu0 %317, %v75_v5   ;;  %322 = vset.pattern.permute.xlu1 %v373_v3 }
  0x14   :  { %90 = vperm.xlu1 %322, %v77_v6  }
  0x15   :  { %323 = vset.pattern.permute.xlu2 %v373_v3 }
  0x16   :  { %85 = vperm.xlu2 %323, %v76_v7  }
  0x1b   :  { %195 = vperm.xlu0 %317, %v182_v8  }
  0x1c   :  { %124 = vperm.xlu1 %322, %v106_v9  }
  0x1e   :  { %119 = vperm.xlu2 %323, %v105_v10  }
  0x23   :  { %245 = vperm.xlu0 %317, %v242_v11  }
  0x24   :  { %114 = vperm.xlu1 %322, %v104_v12  }
  0x26   :  { %109 = vperm.xlu2 %323, %v103_v13   ;;  %v241_v13 = vld [vmem:[%s512_s7] sm:$0x3] }
  0x2c   :  { %190 = vperm.xlu1 %322, %v181_v14  }
  0x2e   :  { %185 = vperm.xlu2 %323, %v180_v15  }
  0x5e   :  { %v40_v16 = vpop.permute.xlu2 %39 }
  0x5f   :  { %v53_v28 = vmul.f32 %v52_v21, %v40_v16 }
  0x67   :  { %v58_v20 = vpop.permute.xlu2 %57 }
  0x68   :  { %v69_v29 = vmul.f32 %v68_v22, %v58_v20 }
  0x6a   :  { %v72_v37 = vadd.f32 %v69_v29, %v53_v28 }
  0x70   :  { %v86_v32 = vpop.permute.xlu2 %85 }
  0x74   :  { %v45_v17 = vpop.permute.xlu1 %44  ;;  %v66_v18 = vpop.permute.xlu0 %65 }
  0x75   :  { %v54_v26 = vmul.f32 %v52_v21, %v45_v17  ;;  %v71_v30 = vmul.f32 %v68_v22, %v66_v18 }
  0x78   :  { %v120_v50 = vpop.permute.xlu2 %119 }
  0x7d   :  { %v50_v23 = vpop.permute.xlu0 %49  ;;  %v62_v24 = vpop.permute.xlu1 %61 }
  0x7e   :  { %v70_v25 = vmul.f32 %v68_v22, %v62_v24  ;;  %v55_v27 = vmul.f32 %v52_v21, %v50_v23 }
  0x80   :  { %v73_v31 = vadd.f32 %v70_v25, %v54_v26  ;;  %v74_v33 = vadd.f32 %v71_v30, %v55_v27  ;;  %v110_v57 = vpop.permute.xlu2 %109 }
  0x82   :  { %v94_v36 = vadd.f32 %v86_v32, %v73_v31 }
  0x85   :  { %v81_v34 = vpop.permute.xlu0 %80 }
  0x86   :  { %v91_v35 = vpop.permute.xlu1 %90  ;;  %v93_v39 = vadd.f32 %v81_v34, %v72_v37 }
  0x87   :  { %v95_v38 = vadd.f32 %v91_v35, %v74_v33 }
  0x88   :  { %v186_v5 = vpop.permute.xlu2 %185 }
  0x89   :  { %324 = vtanh.f32 %v95_v38 }
  0x8a   :  { %326 = vtanh.f32 %v94_v36 }
  0x8b   :  { %328 = vtanh.f32 %v93_v39 }
  0x8d   :  { %v196_v3 = vpop.permute.xlu0 %195 }
  0x8e   :  { %v125_v48 = vpop.permute.xlu1 %124 }
  0x8f   :  { %v325_v40 = vpop.eup %324 }
  0x90   :  { %295 = vmatpush.msk.msra.mxu0 %vm140_vm0, %v325_v40  ;;  %306 = vmatpush.msk.msra.mxu3 %vm140_vm0, %v325_v40  ;;  %v327_v41 = vpop.eup %326 }
  0x91   :  { %v329_v44 = vpop.eup %328 }
  0x92   :  { %158 = vmatpush.msra.mxu0 %v327_v41  ;;  %307 = vmatpush.msra.mxu3 %v327_v41 }
  0x94   :  { %159 = vmatpush.msra.mxu0 %v329_v44  ;;  %308 = vmatpush.msra.mxu3 %v329_v44 }
  0x95   :  { %296 = vmatmul.msk.f32.vlgmr.msra.gmra.mxu0 %vm127_vm1, %v99_v42  ;;  %298 = vmatmul.msk.f32.vlgmr.msra.gmra.mxu3 %vm127_vm1, %v101_v43  ;;  %v246_v15 = vpop.permute.xlu0 %245 }
  0x96   :  { %v115_v55 = vpop.permute.xlu1 %114 }
  0x9d   :  { %297 = vmatmul.msk.f32.gmra.mxu0 %vm127_vm1, %v100_v45  ;;  %299 = vmatmul.msk.f32.gmra.mxu3 %vm127_vm1, %v102_v46 }
  0x9e   :  { %v191_v7 = vpop.permute.xlu1 %190 }
 0x112   :  { %v161_v47 = vpop.f32.mrf.mxu0 }
 0x113   :  { %v162_v58 = vadd.f32 %v161_v47, %v110_v57 }
 0x118   :  { %v167_v49 = vpop.f32.mrf.mxu3 }
 0x119   :  { %v168_v53 = vadd.f32 %v167_v49, %v120_v50 }
 0x11a   :  { %v164_v51 = vpop.f32.mrf.mxu0 }
 0x11b   :  { %v165_v56 = vadd.f32 %v164_v51, %v115_v55 }
 0x120   :  { %v170_v52 = vpop.f32.mrf.mxu3 }
 0x121   :  { %v171_v54 = vadd.f32 %v170_v52, %v125_v48 }
 0x123   :  { %330 = vtanh.f32 %v171_v54 }
 0x124   :  { %332 = vtanh.f32 %v168_v53 }
 0x125   :  { %334 = vtanh.f32 %v165_v56 }
 0x126   :  { %336 = vtanh.f32 %v162_v58 }
 0x129   :  { %v331_v59 = vpop.eup %330 }
 0x12a   :  { %300 = vmatpush.msk.msra.mxu1 %vm208_vm2, %v331_v59  ;;  %309 = vmatpush.msk.msra.mxu2 %vm208_vm2, %v331_v59  ;;  %v333_v60 = vpop.eup %332 }
 0x12b   :  { %v335_v61 = vpop.eup %334 }
 0x12c   :  { %225 = vmatpush.msra.mxu1 %v333_v60  ;;  %310 = vmatpush.msra.mxu2 %v333_v60  ;;  %v337_v0 = vpop.eup %336 }
 0x12e   :  { %226 = vmatpush.msra.mxu1 %v335_v61  ;;  %311 = vmatpush.msra.mxu2 %v335_v61 }
 0x130   :  { %227 = vmatpush.msra.mxu1 %v337_v0  ;;  %312 = vmatpush.msra.mxu2 %v337_v0 }
 0x131   :  { %301 = vmatmul.msk.f32.vlgmr.msra.gmra.mxu1 %vm198_vm3, %v177_v62  ;;  %303 = vmatmul.msk.f32.vlgmr.msra.gmra.mxu2 %vm198_vm3, %v179_v63 }
 0x139   :  { %302 = vmatmul.msk.f32.gmra.mxu1 %vm198_vm3, %v178_v1 }
 0x1ae   :  { %v229_v2 = vpop.f32.mrf.mxu1 }
 0x1af   :  { %v230_v9 = vadd.f32 %v229_v2, %v186_v5 }
 0x1b4   :  { %v235_v4 = vpop.f32.mrf.mxu2 }
 0x1b5   :  { %v236_v6 = vadd.f32 %v235_v4, %v196_v3 }
 0x1b6   :  { %v232_v8 = vpop.f32.mrf.mxu1 }
 0x1b7   :  { %338 = vtanh.f32 %v236_v6  ;;  %v233_v10 = vadd.f32 %v232_v8, %v191_v7 }
 0x1b9   :  { %340 = vtanh.f32 %v233_v10 }
 0x1ba   :  { %342 = vtanh.f32 %v230_v9 }
 0x1bd   :  { %v339_v11 = vpop.eup %338 }
 0x1be   :  { %304 = vmatpush.msk.msrb.mxu2 %vm140_vm0, %v339_v11 }
 0x1bf   :  { %v341_v12 = vpop.eup %340 }
 0x1c0   :  { %268 = vmatpush.msrb.mxu2 %v341_v12  ;;  %v343_v14 = vpop.eup %342 }
 0x1c2   :  { %269 = vmatpush.msrb.mxu2 %v343_v14 }
 0x1c3   :  { %305 = vmatmul.msk.f32.vlgmr.msrb.gmra.mxu2 %vm127_vm1, %v241_v13 }
 0x246   :  { %v271_v16 = vpop.f32.mrf.mxu2 }
 0x247   :  { %v272_v17 = vadd.f32 %v271_v16, %v246_v15 }
 0x249   :  { %344 = vtanh.f32 %v272_v17 }
 0x24f   :  { %v345_v18 = vpop.eup %344 }
 0x250   :  { %v275_v19 = vmul.f32 0.5, %v345_v18 }
 0x252   :  { %v276_v20 = vadd.f32 0.5, %v275_v19 }
 0x254   :  { %278 = vst.msk [vmem:[#allocation2] sm:$0x3] %vm277_vm4, %v276_v20 }
 0x255   :  { %289 = dma.vmem_to_hbm [thread:$0]  %s285_s26, 32, %s287_s28, [#allocation3]  }
 0x256   :  { %370 = dma.done.wait [#allocation3], 32  }
 0x257   :  { %371 = vsyncadd [#allocation3], 4294967264 }
 0x258   :  { %294 = vsyncpa [#allocation3], 1 }

</bundles_post_ra>
